<compile_context>
chip_gen: v7x
topology: tpu7x:2x2x1
jax: 0.10.0
libtpu: 0.0.40
codegen_flags: <defaults>
</compile_context>

<pallas_src>
import functools

import jax
import jax.numpy as jnp
import numpy as np
from jax.experimental import pallas as pl
from jax.experimental.pallas import tpu as pltpu


# ----------------------------------------------------------------------------
# in-kernel helpers (alpha / k_bits are static Python numbers -> folded scales)
# ----------------------------------------------------------------------------
def _pams_quant(x, alpha, k_bits):
    """PAMS symmetric k-bit fake-quant; both scales folded at trace time."""
    qmax = 2.0 ** (k_bits - 1) - 1.0
    return jnp.round(jnp.clip(x, -alpha, alpha) * (qmax / alpha)) * (alpha / qmax)


def _bitsel_mixture(x, p_ref, b, alphas, bit_list):
    """x_q = sum_i p[b, i] * PAMS(x, alpha_i, k_i).

    The mixture probability and the dequant scale are folded into ONE scalar
    coefficient per bit level (saves a full-tensor VPU multiply per level).
    """
    acc = None
    for i, k in enumerate(bit_list):
        qmax = 2.0 ** (k - 1) - 1.0
        coeff = p_ref[b, i] * (alphas[i] / qmax)            # one runtime scalar
        t = jnp.round(jnp.clip(x, -alphas[i], alphas[i]) * (qmax / alphas[i])) * coeff
        acc = t if acc is None else acc + t
    return acc


def _conv3x3_lanes(x, w_ref, m_ref, rolls, c_out, hw):
    """3x3 / pad=1 conv on a (C_in, H*W) activation.

    Nine accumulating (C_out, C_in) @ (C_in, H*W) MXU matmuls with bf16
    operands and f32 accumulation.  Each tap operand is an XLU lane roll of
    the activation masked by a precomputed 0/1 border mask -- no im2col patch
    matrix, no lane-axis concat, no unaligned sublane slices.
    """
    acc = jnp.zeros((c_out, hw), jnp.float32)
    for k, r in enumerate(rolls):
        if r == 0:                                          # center tap
            tap = x
        else:
            tap = pltpu.roll(x, shift=r, axis=1) * m_ref[k]
        acc = acc + jnp.dot(w_ref[k], tap.astype(jnp.bfloat16),
                            preferred_element_type=jnp.float32)
    return acc


# ----------------------------------------------------------------------------
# Pallas kernels
# ----------------------------------------------------------------------------
def _conv1_fused_kernel(p_ref, x_ref, w_ref, m_ref, y_ref, res_ref, mom_ref, *,
                        hw, c_out, rolls, alphas, bit_list):
    """BitSelector-1 mixture -> quantized 3x3 conv -> ReLU (+ centered moments).

    p_ref   : (B, n_bits) f32 in SMEM (softmax probabilities)
    x_ref   : (Cin, H*W)  VMEM block of the current batch element
    w_ref   : (9, Cout, Cin) bf16 per-tap weights
    m_ref   : (9, 1, H*W) f32 border masks
    y_ref   : (Cout, H*W) relu(conv) output (lane-dense store)
    res_ref : (Cin, H*W)  mixture output (the block's residual)
    mom_ref : (Cout, 2)   per-channel [mean, sum((y-mean)^2)]
    """
    b = pl.program_id(0)
    mixed = _bitsel_mixture(x_ref[...], p_ref, b, alphas, bit_list)   # f32
    res_ref[...] = mixed
    acc = _conv3x3_lanes(mixed, w_ref, m_ref, rolls, c_out, hw)
    acc = jnp.maximum(acc, 0.0)                                       # fused ReLU
    y_ref[...] = acc
    # centered per-channel moments for BitSelector-2's torch.std
    mean = jnp.mean(acc, axis=1, keepdims=True)                       # (Cout, 1)
    d = acc - mean
    mom_ref[...] = jnp.concatenate([mean, jnp.sum(d * d, axis=1, keepdims=True)],
                                   axis=1)


def _conv2_fused_kernel(p_ref, x_ref, res_ref, w_ref, m_ref, o_ref, *maybe_f1,
                        hw, c_out, rolls, alphas, bit_list,
                        res_scale, qact_alpha, k_bits, emit_f1):
    """BitSelector-2 mixture -> quantized 3x3 conv -> (*res_scale, quant, +res)."""
    b = pl.program_id(0)
    mixed = _bitsel_mixture(x_ref[...], p_ref, b, alphas, bit_list)
    acc = _conv3x3_lanes(mixed, w_ref, m_ref, rolls, c_out, hw)
    if emit_f1:
        maybe_f1[0][...] = acc                    # f1: raw conv2 output (KD feature)
    out = acc * res_scale
    if k_bits < 32:
        out = _pams_quant(out, qact_alpha, k_bits)
    o_ref[...] = out + res_ref[...]


# ----------------------------------------------------------------------------
# static tap constants (roll amounts + border masks)
# ----------------------------------------------------------------------------
@functools.lru_cache(maxsize=None)
def _pltpu_roll_sign():
    """+1 if pltpu.roll matches the jnp.roll convention (out[i] = x[i - shift]),
    -1 otherwise.  One-off 1-vreg probe so tap shifts are portable across
    rotate-direction definitions."""
    def probe(x_ref, o_ref):
        o_ref[...] = pltpu.roll(x_ref[...], shift=1, axis=1)

    x = jax.lax.broadcasted_iota(jnp.float32, (8, 128), 1)
    r = pl.pallas_call(probe, out_shape=jax.ShapeDtypeStruct((8, 128), jnp.float32))(x)
    return 1 if float(r[0, 0]) > 64.0 else -1


def _conv_tap_consts(H, W):
    """Per-tap lane-roll amounts + 0/1 border masks for a 3x3 / pad=1 conv on a
    channels-major (C, H*W) activation (pixels flattened on the lane axis)."""
    hw = H * W
    sign = _pltpu_roll_sign()
    hh, ww = np.meshgrid(np.arange(H), np.arange(W), indexing="ij")
    hh, ww = hh.reshape(-1), ww.reshape(-1)
    rolls, masks = [], []
    for dh in range(3):
        for dw in range(3):
            oh, ow = dh - 1, dw - 1
            s = oh * W + ow                               # want tap[n] = x[n + s]
            rolls.append(int((-s if sign > 0 else s) % hw))
            valid = ((hh + oh >= 0) & (hh + oh < H) &
                     (ww + ow >= 0) & (ww + ow < W))
            masks.append(valid.astype(np.float32))
    return tuple(rolls), jnp.asarray(np.stack(masks)[:, None, :])     # (9, 1, HW)


# ----------------------------------------------------------------------------
# pallas_call wrappers
# ----------------------------------------------------------------------------
_VMEM_LIMIT = 32 * 1024 * 1024   # explicit scoped-VMEM budget; actual use << this


def conv1_fused(x_flat, probs, w_taps, masks, rolls, alphas, bit_list):
    B, c_in, hw = x_flat.shape
    c_out = w_taps.shape[1]
    kern = functools.partial(
        _conv1_fused_kernel, hw=hw, c_out=c_out, rolls=rolls,
        alphas=tuple(float(a) for a in alphas),
        bit_list=tuple(int(k) for k in bit_list))
    return pl.pallas_call(
        kern,
        out_shape=(
            jax.ShapeDtypeStruct((B, c_out, hw), jnp.float32),   # relu(conv1)
            jax.ShapeDtypeStruct((B, c_in, hw), jnp.float32),    # residual
            jax.ShapeDtypeStruct((B, c_out, 2), jnp.float32),    # [mean, centered ss]
        ),
        grid=(B,),
        in_specs=[
            pl.BlockSpec(memory_space=pltpu.MemorySpace.SMEM),        # probs
            pl.BlockSpec((None, c_in, hw), lambda b: (b, 0, 0)),      # x
            pl.BlockSpec((9, c_out, c_in), lambda b: (0, 0, 0)),      # weights (bf16)
            pl.BlockSpec((9, 1, hw), lambda b: (0, 0, 0)),            # border masks
        ],
        out_specs=(
            pl.BlockSpec((None, c_out, hw), lambda b: (b, 0, 0)),
            pl.BlockSpec((None, c_in, hw), lambda b: (b, 0, 0)),
            pl.BlockSpec((None, c_out, 2), lambda b: (b, 0, 0)),
        ),
        compiler_params=pltpu.CompilerParams(
            dimension_semantics=("parallel",),
            vmem_limit_bytes=_VMEM_LIMIT),
    )(probs, x_flat, w_taps, masks)


def conv2_fused(x_flat, res_flat, probs, w_taps, masks, rolls, alphas, bit_list,
                res_scale, qact_alpha, k_bits, emit_f1):
    B, c_in, hw = x_flat.shape
    c_out = w_taps.shape[1]
    kern = functools.partial(
        _conv2_fused_kernel, hw=hw, c_out=c_out, rolls=rolls,
        alphas=tuple(float(a) for a in alphas),
        bit_list=tuple(int(k) for k in bit_list),
        res_scale=float(res_scale), qact_alpha=float(qact_alpha),
        k_bits=int(k_bits), emit_f1=bool(emit_f1))
    out_sds = jax.ShapeDtypeStruct((B, c_out, hw), jnp.float32)
    out_spec = pl.BlockSpec((None, c_out, hw), lambda b: (b, 0, 0))
    if emit_f1:
        out_shape, out_specs = (out_sds, out_sds), (out_spec, out_spec)
    else:
        out_shape, out_specs = out_sds, out_spec
    res = pl.pallas_call(
        kern,
        out_shape=out_shape,
        grid=(B,),
        in_specs=[
            pl.BlockSpec(memory_space=pltpu.MemorySpace.SMEM),                 # probs
            pl.BlockSpec((None, c_in, hw), lambda b: (b, 0, 0)),               # relu(conv1)
            pl.BlockSpec((None, res_flat.shape[1], hw), lambda b: (b, 0, 0)),  # residual
            pl.BlockSpec((9, c_out, c_in), lambda b: (0, 0, 0)),               # weights
            pl.BlockSpec((9, 1, hw), lambda b: (0, 0, 0)),                     # masks
        ],
        out_specs=out_specs,
        compiler_params=pltpu.CompilerParams(
            dimension_semantics=("parallel",),
            vmem_limit_bytes=_VMEM_LIMIT),
    )(probs, x_flat, res_flat, w_taps, masks)
    if emit_f1:
        return res[0], res[1]
    return res, None


# ----------------------------------------------------------------------------
# glue (tiny host-side ops: weight quant, linear+softmax, std from moments)
# ----------------------------------------------------------------------------
def quantize_weight(w, k_bits):
    """PAMS symmetric per-tensor weight fake-quant, emitted as bf16 MXU
    operands (accumulation stays f32 in the kernels)."""
    if k_bits < 32:
        qmax = 2.0 ** (k_bits - 1) - 1.0
        scale = jnp.maximum(jnp.max(jnp.abs(w)) / qmax, 1e-12)   # guard all-zero w
        w = jnp.round(w / scale) * scale
    return w.astype(jnp.bfloat16)


def _bit_probs(feat_std, grad, lin_w, bit_list):
    x_embed = jnp.concatenate([feat_std, grad], axis=1)          # (B, C+1)
    logits = x_embed @ lin_w.T                                   # (B, n_bits)
    p = jax.nn.softmax(logits, axis=1)
    soft_bits = p @ jnp.asarray(bit_list, jnp.float32)           # (B,)
    return p, soft_bits


# ----------------------------------------------------------------------------
# ResidualBlock_CADyQ forward
# ----------------------------------------------------------------------------
def residual_block_cadyq_forward(params, inputs, *, res_scale, k_bits,
                                 bit_list=(4, 6, 8), loss_kdf=False):
    grad, x, bits, f, weighted_bits = inputs          # x: NCHW (PyTorch layout)
    B, C, H, W = x.shape
    hw = H * W
    x_flat = x.reshape(B, C, hw)                      # channels-major, pixels on lanes
    rolls, masks = _conv_tap_consts(H, W)

    # ---- BitSelector 1 (torch.std over H,W per channel, unbiased) ----------
    std1 = jnp.std(x, axis=(2, 3), ddof=1)
    p1, sb1 = _bit_probs(std1, grad, params["bitsel1_w"], bit_list)
    bits = bits + sb1[:, None]
    weighted_bits = weighted_bits + sb1[:, None]

    # ---- fused kernel 1: mixture + quantized conv1 + ReLU (+ moments) ------
    w1 = quantize_weight(params["conv1_w"], k_bits)
    y, residual, mom = conv1_fused(x_flat, p1, w1, masks, rolls,
                                   params["bitsel1_alphas"], bit_list)

    # ---- BitSelector 2 (std straight from the in-kernel centered moments) --
    std2 = jnp.sqrt(jnp.maximum(mom[:, :, 1], 0.0) / (hw - 1.0))
    p2, sb2 = _bit_probs(std2, grad, params["bitsel2_w"], bit_list)
    bits = bits + sb2[:, None]
    weighted_bits = weighted_bits + sb2[:, None]

    # ---- fused kernel 2: mixture + quantized conv2 + scale/quant/add -------
    w2 = quantize_weight(params["conv2_w"], k_bits)
    out_flat, f1_flat = conv2_fused(y, residual, p2, w2, masks, rolls,
                                    params["bitsel2_alphas"], bit_list,
                                    res_scale, params["qact3_alpha"], k_bits,
                                    emit_f1=loss_kdf)
    out = out_flat.reshape(B, -1, H, W)

    if loss_kdf:
        f1 = f1_flat.reshape(B, -1, H, W)
        f = f1[None] if f is None else jnp.concatenate([f, f1[None]], axis=0)
    else:
        f = None
    return [grad, out, bits, f, weighted_bits]


# ----------------------------------------------------------------------------
# deterministic parameter init  (conv weights stored tap-major (9, Cout, Cin))
# ----------------------------------------------------------------------------
def init_params(key, c_in, c_out):
    ks = jax.random.split(key, 4)

    def conv_init(k, ci, co):
        w = jax.random.normal(k, (co, ci, 3, 3), jnp.float32) / jnp.sqrt(ci * 9.0)
        # PyTorch OIHW -> tap-major (9, Cout, Cin): tap k = kh*3+kw is w[:, :, kh, kw]
        return jnp.transpose(w, (2, 3, 0, 1)).reshape(9, co, ci)

    return {
        "bitsel1_w": 0.1 * jax.random.normal(ks[0], (3, c_in + 1), jnp.float32),
        "bitsel1_alphas": (2.0, 2.5, 3.0),   # quant_act_pams alphas (4/6/8 bit)
        "conv1_w": conv_init(ks[1], c_in, c_out),
        "bitsel2_w": 0.1 * jax.random.normal(ks[2], (3, c_out + 1), jnp.float32),
        "bitsel2_alphas": (2.0, 2.5, 3.0),
        "conv2_w": conv_init(ks[3], c_out, c_out),
        "qact3_alpha": 2.0,                  # quant_act_pams alpha (k_bits)
    }


# ----------------------------------------------------------------------------
# pure-JAX reference with the same numerics contract (bf16 conv operands,
# f32 accumulation) for the self-check
# ----------------------------------------------------------------------------
def _reference_forward(params, inputs, *, res_scale, k_bits, bit_list):
    grad, x, bits, _, weighted_bits = inputs          # x: NCHW

    def pams_q(v, alpha, k):
        qmax = 2.0 ** (k - 1) - 1.0
        return jnp.round(jnp.clip(v, -alpha, alpha) * (qmax / alpha)) * (alpha / qmax)

    def bitsel(v, lin_w, alphas):
        std = jnp.std(v, axis=(2, 3), ddof=1)
        logits = jnp.concatenate([std, grad], axis=1) @ lin_w.T
        p = jax.nn.softmax(logits, axis=1)
        mix = sum(p[:, i][:, None, None, None]
                  * pams_q(v, float(alphas[i]), int(bit_list[i]))
                  for i in range(len(bit_list)))
        soft = p @ jnp.asarray(bit_list, jnp.float32)
        return mix, soft

    def conv3x3(v, w_taps):
        co, ci = w_taps.shape[1], w_taps.shape[2]
        w_hwio = jnp.transpose(w_taps.reshape(3, 3, co, ci), (0, 1, 3, 2))
        return jax.lax.conv_general_dilated(
            v.astype(jnp.bfloat16), w_hwio, (1, 1), "SAME",
            dimension_numbers=("NCHW", "HWIO", "NCHW"),
            preferred_element_type=jnp.float32)

    x1, sb1 = bitsel(x, params["bitsel1_w"], params["bitsel1_alphas"])
    residual = x1
    y = jnp.maximum(conv3x3(x1, quantize_weight(params["conv1_w"], k_bits)), 0.0)
    x2, sb2 = bitsel(y, params["bitsel2_w"], params["bitsel2_alphas"])
    f1 = conv3x3(x2, quantize_weight(params["conv2_w"], k_bits))
    out = f1 * res_scale
    if k_bits < 32:
        out = pams_q(out, float(params["qact3_alpha"]), int(k_bits))
    out = out + residual
    bits_o = bits + sb1[:, None] + sb2[:, None]
    wbits_o = weighted_bits + sb1[:, None] + sb2[:, None]
    return out, bits_o, wbits_o, f1


if __name__ == "__main__":
    B, C, H, W = 2, 32, 16, 16
    key = jax.random.PRNGKey(0)
    k_x, k_grad, k_par = jax.random.split(key, 3)

    x = jax.random.normal(k_x, (B, C, H, W), jnp.float32)
    grad = jnp.abs(jax.random.normal(k_grad, (B, 1), jnp.float32))
    bits = jnp.zeros((B, 1), jnp.float32)
    weighted_bits = jnp.zeros((B, 1), jnp.float32)

    params = init_params(k_par, C, C)

    # --- loss_kdf=False path -------------------------------------------------
    outs = residual_block_cadyq_forward(
        params, [grad, x, bits, None, weighted_bits],
        res_scale=0.1, k_bits=8, bit_list=(4, 6, 8), loss_kdf=False)
    grad_o, out, bits_o, f_o, wbits_o = outs
    jax.block_until_ready(out)
    jax.block_until_ready(bits_o)
    jax.block_until_ready(wbits_o)

    ref_out, ref_bits, ref_wbits, ref_f1 = _reference_forward(
        params, [grad, x, bits, None, weighted_bits],
        res_scale=0.1, k_bits=8, bit_list=(4, 6, 8))

    # quantization boundaries can flip a value by one step, so allow ~1 step
    # on the max error; everything else matches to f32/bf16 rounding noise.
    diff = np.abs(np.asarray(out) - np.asarray(ref_out))
    assert diff.max() <= 2e-2, f"max |diff| too large: {diff.max()}"
    assert diff.mean() <= 1e-3, f"mean |diff| too large: {diff.mean()}"
    np.testing.assert_allclose(np.asarray(bits_o), np.asarray(ref_bits),
                               rtol=1e-4, atol=1e-4)
    np.testing.assert_allclose(np.asarray(wbits_o), np.asarray(ref_wbits),
                               rtol=1e-4, atol=1e-4)
    assert out.shape == (B, C, H, W) and out.dtype == jnp.float32
    assert bits_o.shape == (B, 1) and wbits_o.shape == (B, 1)
    assert f_o is None

    # --- loss_kdf=True path (KD feature tap) ---------------------------------
    outs_kd = residual_block_cadyq_forward(
        params, [grad, x, bits, None, weighted_bits],
        res_scale=0.1, k_bits=8, bit_list=(4, 6, 8), loss_kdf=True)
    _, out_kd, _, f_kd, _ = outs_kd
    jax.block_until_ready(out_kd)
    assert f_kd.shape == (1, B, C, H, W)
    f1_diff = np.abs(np.asarray(f_kd[0]) - np.asarray(ref_f1))
    assert f1_diff.max() <= 2e-2, f"f1 max |diff| too large: {f1_diff.max()}"

    print("KERNEL_OK")
</pallas_src>

<mosaic_0001>
module attributes {stable_mosaic.version = 11 : i64} {
  func.func @probe(%arg0: memref<8x128xf32, #tpu.memory_space<vmem>>, %arg1: memref<8x128xf32, #tpu.memory_space<vmem>>) attributes {dimension_semantics = [], scalar_prefetch = 0 : i64, scratch_operands = 0 : i64, tpu.core_type = #tpu.core_type<tc>} {
    %c0 = arith.constant 0 : index
    %c0_0 = arith.constant 0 : index
    %0 = vector.load %arg0[%c0, %c0_0] : memref<8x128xf32, #tpu.memory_space<vmem>>, vector<8x128xf32>
    %c1_i32 = arith.constant 1 : i32
    %1 = tpu.dynamic_rotate %0 by %c1_i32 dim 1 : vector<8x128xf32>, i32 -> vector<8x128xf32>
    %c0_1 = arith.constant 0 : index
    %c0_2 = arith.constant 0 : index
    %2 = vector.load %arg1[%c0_1, %c0_2] : memref<8x128xf32, #tpu.memory_space<vmem>>, vector<8x128xf32>
    tpu.vector_store %arg1[%c0_1, %c0_2], %1 {strides = array<i32>} : memref<8x128xf32, #tpu.memory_space<vmem>>, vector<8x128xf32>,
    return
  }
}

</mosaic_0001>

<bundles_post_ra>
// kernel: tpu_custom_call.1
= control target key start
LH: loop header
LB: loop body
LE: loop exit
PB: predicated region body
PF: predicated region fallthrough
CT: control target
= control target key end

     0   :  { %6 = vsyncpa [#allocation3], 0  ;;  %s128_s0 = inlined_call_operand.hbm [shape: f32[8,128], index: 0, kind: input, shape index: {}]   ;;  %s129_s1 = inlined_call_operand.hbm [shape: f32[8,128], index: 1, kind: output, shape index: {}]  }
   0x1   :  { %7 = vsyncpa [#allocation4], 0  ;;  %s91_s6 = smov [#allocation2]   ;;  %s43_s10 = scalar_lea.hbm %s128_s0, 128 }
   0x2   :  { %s14_s7 = sshll.u32 %s91_s6, 4  ;;  %p44_p0 = scmp.ne.s32.totalorder %s128_s0, %s43_s10  ;;  %s15_s7 = int_to_ptr.vmem [resolvable:$true] %s14_s7 }
   0x3   :  { %p47_p1 = scmp.lt.u32.totalorder %s43_s10, %s128_s0 }
   0x5   :  { %p49_p2 = pnand %p47_p1, %p44_p0 }
   0x7   :  { %52 = shalt.err (!%p49_p2)
}
   0x8   :  { %s53_s15 = scalar_lea.vmem %s15_s7, 128  ;;  %p58_p4 = scmp.lt.s32.totalorder %s15_s7, %s15_s7 }
   0x9   :  { %p54_p3 = scmp.ne.s32.totalorder %s15_s7, %s53_s15  ;;  %p59_p5 = scmp.lt.s32.totalorder %s53_s15, %s53_s15 }
   0xb   :  { %p60_p6 = por %p59_p5, %p58_p4 }
   0xd   :  { %p61_p7 = pnand %p60_p6, %p54_p3 }
   0xf   :  { %64 = shalt.err (!%p61_p7)
}
  0x10   :  { %17 = dma.hbm_to_vmem [thread:$0]  %s128_s0, 128, %s15_s7, [#allocation3]  }
  0x11   :  { %87 = dma.done.wait [#allocation3], 128  }
  0x12   :  { %88 = vsyncadd [#allocation3], 4294967168  ;;  %v21_v0 = vld [vmem:[#allocation2] sm:$0xff]  ;;  %s92_s18 = smov 1   ;;  %s93_s19 = smov [#allocation5]  }
  0x13   :  { %22 = vrot.lane.b32.xlu0 %v21_v0, %s92_s18  ;;  %s31_s20 = sshll.u32 %s93_s19, 4  ;;  %s32_s20 = int_to_ptr.vmem [resolvable:$true] %s31_s20 }
  0x14   :  { %s65_s21 = scalar_lea.vmem %s32_s20, 128  ;;  %p70_p9 = scmp.lt.s32.totalorder %s32_s20, %s32_s20 }
  0x15   :  { %p66_p8 = scmp.ne.s32.totalorder %s32_s20, %s65_s21  ;;  %p71_p10 = scmp.lt.s32.totalorder %s65_s21, %s65_s21 }
  0x17   :  { %p72_p11 = por %p71_p10, %p70_p9 }
  0x19   :  { %p73_p12 = pnand %p72_p11, %p66_p8 }
  0x85   :  { %v23_v1 = vpop.permute.xlu0 %22 }
  0x86   :  { %24 = vst [vmem:[#allocation5] sm:$0xff] %v23_v1 }
  0x87   :  { %76 = shalt.err (!%p73_p12)
}
  0x88   :  { %s77_s0 = scalar_lea.hbm %s129_s1, 128 }
  0x89   :  { %p78_p13 = scmp.ne.s32.totalorder %s129_s1, %s77_s0  ;;  %p81_p0 = scmp.lt.u32.totalorder %s77_s0, %s129_s1 }
  0x8b   :  { %p83_p1 = pnand %p81_p0, %p78_p13 }
  0x8d   :  { %86 = shalt.err (!%p83_p1)
}
  0x8e   :  { %34 = dma.vmem_to_hbm [thread:$0]  %s32_s20, 128, %s129_s1, [#allocation4]  }
  0x8f   :  { %89 = dma.done.wait [#allocation4], 128  }
  0x90   :  { %90 = vsyncadd [#allocation4], 4294967168 }
  0x91   :  { %38 = vsyncpa [#allocation3], 1 }
  0x92   :  { %39 = vsyncpa [#allocation4], 1 }

</bundles_post_ra>
